<compile_context>
chip_gen: v7x
topology: tpu7x:2x2x1
jax: 0.10.0
libtpu: 0.0.40
codegen_flags: <defaults>
</compile_context>

<pallas_src>
import numpy as np
import jax
import jax.numpy as jnp
from jax.experimental import pallas as pl
from jax.experimental.pallas import tpu as pltpu

IN_DIM = 8
OUT_DIM = 64
PACKED_IN = 2 * IN_DIM        # 16 lanes:  [x_re | x_im]
PACKED_OUT = 2 * OUT_DIM      # 128 lanes: [y_re | y_im]
MAX_TILE_M = 8192             # amortizes per-step pipeline overhead; ~16.5 MiB
VMEM_LIMIT_BYTES = 48 * 1024 * 1024   # headroom under v7x 64 MiB physical VMEM


def _cplx_linear_kernel(x_ref, w_ref, o_ref):
    # Packed complex matmul (single MXU push per tile):
    #   [y_re | y_im] = [x_re | x_im] @ [[ Wt_re | Wt_im],
    #                                    [-Wt_im | Wt_re]]
    o_ref[...] = jnp.dot(
        x_ref[...], w_ref[...], preferred_element_type=jnp.float32
    ).astype(o_ref.dtype)


def make_aoa_weights():
    """Deterministic weights from the module __init__: W[h, j] = exp(-i*2*pi*j*hh/64)."""
    h = np.arange(OUT_DIM)
    hh = (h + 32) % OUT_DIM
    j = np.arange(IN_DIM)
    phase = -2.0 * np.pi * np.outer(hh, j) / float(OUT_DIM)   # (64, 8)
    w = np.exp(1j * phase).astype(np.complex64)               # (64, 8) == W
    wt = w.T                                                  # (8, 64)  == W^T
    return (jnp.asarray(wt.real, dtype=jnp.float32),
            jnp.asarray(wt.imag, dtype=jnp.float32))


def pack_aoa_weights(wt_re, wt_im):
    """Pack the (8,64) re/im weights into one lane-dense (16,128) matrix."""
    w1 = jnp.concatenate([wt_re, wt_im], axis=1)     # (8, 128)  top block
    w2 = jnp.concatenate([-wt_im, wt_re], axis=1)    # (8, 128)  bottom block
    return jnp.concatenate([w1, w2], axis=0)         # (16, 128)


def _round_up(x, n):
    return ((x + n - 1) // n) * n


def aoa_fourier_net(x_re, x_im, w_cat, *, out_dtype=jnp.float32,
                    xla_fallback_rows=0):
    """Apply the complex Fourier linear layer.

    x_re, x_im: (..., 8) float32
    w_cat:      (16, 128) float32 packed weights from pack_aoa_weights()
    out_dtype:  dtype of the stored result (float32 default; bfloat16 halves
                the dominant HBM writeback traffic if the consumer tolerates it)
    xla_fallback_rows: if 0 < M <= this, use a plain XLA dot instead of the
                Pallas kernel (avoids launch overhead dominating tiny inputs).
    returns (y_re, y_im): (..., 64) of out_dtype
    """
    lead_shape = x_re.shape[:-1]
    m = int(np.prod(lead_shape)) if lead_shape else 1

    if m == 0:
        z = jnp.zeros((*lead_shape, OUT_DIM), dtype=out_dtype)
        return z, z

    xr = x_re.reshape(m, IN_DIM)
    xi = x_im.reshape(m, IN_DIM)
    x_cat = jnp.concatenate([xr, xi], axis=-1)        # (m, 16)

    if m <= xla_fallback_rows:
        # Tiny input: pallas_call overhead would dominate; let XLA handle it.
        y_cat = jnp.dot(x_cat, w_cat,
                        preferred_element_type=jnp.float32).astype(out_dtype)
        y_re = y_cat[:, :OUT_DIM].reshape(*lead_shape, OUT_DIM)
        y_im = y_cat[:, OUT_DIM:].reshape(*lead_shape, OUT_DIM)
        return y_re, y_im

    # Tile the row axis; pad M up to a tile multiple (zero rows are benign:
    # the matmul never mixes rows and padded outputs are sliced off below).
    tile_m = min(MAX_TILE_M, _round_up(m, 8))
    pad_m = _round_up(m, tile_m)
    if pad_m != m:
        x_cat = jnp.pad(x_cat, ((0, pad_m - m), (0, 0)))
    num_tiles = pad_m // tile_m

    out_bytes = jnp.dtype(out_dtype).itemsize
    cost = pl.CostEstimate(
        flops=2 * pad_m * PACKED_IN * PACKED_OUT,
        transcendentals=0,
        bytes_accessed=(4 * pad_m * PACKED_IN                 # merged input
                        + out_bytes * pad_m * PACKED_OUT      # packed output
                        + 4 * PACKED_IN * PACKED_OUT),        # weights
    )

    y_cat = pl.pallas_call(
        _cplx_linear_kernel,
        out_shape=jax.ShapeDtypeStruct((pad_m, PACKED_OUT), out_dtype),
        grid=(num_tiles,),
        in_specs=[
            pl.BlockSpec((tile_m, PACKED_IN), lambda i: (i, 0)),
            # Weights stay VMEM-resident across the whole grid.
            pl.BlockSpec((PACKED_IN, PACKED_OUT), lambda i: (0, 0)),
        ],
        out_specs=pl.BlockSpec((tile_m, PACKED_OUT), lambda i: (i, 0)),
        compiler_params=pltpu.CompilerParams(
            # Rows fully independent -> v7x can shard the grid across both
            # TensorCores; near-zero cost on v5e/v6e.
            dimension_semantics=("parallel",),
            # Accounts for lane padding of the (tile_m, 16) input block to
            # 128 lanes in VMEM (~16.5 MiB double-buffered at tile_m=8192);
            # also overrides v5e's 16 MiB default scoped limit.
            vmem_limit_bytes=VMEM_LIMIT_BYTES,
        ),
        cost_estimate=cost,
    )(x_cat, w_cat)

    y_re = y_cat[:m, :OUT_DIM].reshape(*lead_shape, OUT_DIM)
    y_im = y_cat[:m, OUT_DIM:].reshape(*lead_shape, OUT_DIM)
    return y_re, y_im


if __name__ == "__main__":
    key = jax.random.PRNGKey(0)
    k1, k2 = jax.random.split(key)

    # Small input consistent with the module: last dim must be 8 (antenna dim).
    B, C, S = 2, 4, 16
    x_re = jax.random.normal(k1, (B, C, S, IN_DIM), dtype=jnp.float32)
    x_im = jax.random.normal(k2, (B, C, S, IN_DIM), dtype=jnp.float32)

    wt_re, wt_im = make_aoa_weights()
    w_cat = pack_aoa_weights(wt_re, wt_im)

    # f32 output path (default, exact semantics of the module).
    y_re, y_im = aoa_fourier_net(x_re, x_im, w_cat)
    y_re = jax.block_until_ready(y_re)
    y_im = jax.block_until_ready(y_im)

    # Reference check in plain JAX complex arithmetic.
    x_c = x_re.astype(jnp.complex64) + 1j * x_im.astype(jnp.complex64)
    w_c = (wt_re + 1j * wt_im).astype(jnp.complex64)          # (8, 64) == W^T
    y_ref = jnp.einsum("bcsk,kn->bcsn", x_c, w_c)
    assert jnp.allclose(y_re, y_ref.real, atol=1e-4, rtol=1e-4)
    assert jnp.allclose(y_im, y_ref.imag, atol=1e-4, rtol=1e-4)

    # bf16 writeback path (optional HBM-traffic optimization): loose sanity check.
    yb_re, yb_im = aoa_fourier_net(x_re, x_im, w_cat, out_dtype=jnp.bfloat16)
    yb_re = jax.block_until_ready(yb_re)
    yb_im = jax.block_until_ready(yb_im)
    assert float(jnp.max(jnp.abs(yb_re.astype(jnp.float32) - y_ref.real))) < 0.1
    assert float(jnp.max(jnp.abs(yb_im.astype(jnp.float32) - y_ref.imag))) < 0.1

    print("KERNEL_OK")
</pallas_src>

<mosaic_0001>
module attributes {stable_mosaic.version = 11 : i64} {
  func.func @_cplx_linear_kernel(%arg0: i32, %arg1: memref<128x16xf32, #tpu.memory_space<vmem>>, %arg2: memref<16x128xf32, #tpu.memory_space<vmem>>, %arg3: memref<128x128xf32, #tpu.memory_space<vmem>>) attributes {dimension_semantics = [#tpu.dimension_semantics<parallel>], iteration_bounds = array<i64: 1>, scalar_prefetch = 0 : i64, scratch_operands = 0 : i64, tpu.core_type = #tpu.core_type<tc>, window_params = [{transform_indices = @transform_0, window_bounds = array<i64: 128, 16>}, {pipeline_mode = #tpu.pipeline_mode<synchronous>, transform_indices = @transform_1, window_bounds = array<i64: 16, 128>}, {transform_indices = @transform_2, window_bounds = array<i64: 128, 128>}]} {
    %c0 = arith.constant 0 : index
    %c0_0 = arith.constant 0 : index
    %0 = vector.load %arg1[%c0, %c0_0] : memref<128x16xf32, #tpu.memory_space<vmem>>, vector<128x16xf32>
    %c0_1 = arith.constant 0 : index
    %c0_2 = arith.constant 0 : index
    %1 = vector.load %arg2[%c0_1, %c0_2] : memref<16x128xf32, #tpu.memory_space<vmem>>, vector<16x128xf32>
    %cst = arith.constant dense<0.000000e+00> : vector<128x128xf32>
    %2 = tpu.matmul %0, %1, %cst {dimension_numbers = #tpu.dot_dimension_numbers<[1], [0], [0], [1], [0, 0, 1, 1], [], []>} : vector<128x16xf32>, vector<16x128xf32>, vector<128x128xf32> -> vector<128x128xf32>
    %c0_3 = arith.constant 0 : index
    %c0_4 = arith.constant 0 : index
    %3 = vector.load %arg3[%c0_3, %c0_4] : memref<128x128xf32, #tpu.memory_space<vmem>>, vector<128x128xf32>
    tpu.vector_store %arg3[%c0_3, %c0_4], %2 {strides = array<i32>} : memref<128x128xf32, #tpu.memory_space<vmem>>, vector<128x128xf32>,
    return
  }
  func.func @transform_0(%arg0: i32) -> (i32, i32) {
    %c0_i32 = arith.constant 0 : i32
    %c0_i32_0 = arith.constant 0 : i32
    return %arg0, %c0_i32 : i32, i32
  }
  func.func @transform_1(%arg0: i32) -> (i32, i32) {
    %c0_i32 = arith.constant 0 : i32
    %c0_i32_0 = arith.constant 0 : i32
    %c0_i32_1 = arith.constant 0 : i32
    return %c0_i32, %c0_i32_0 : i32, i32
  }
  func.func @transform_2(%arg0: i32) -> (i32, i32) {
    %c0_i32 = arith.constant 0 : i32
    %c0_i32_0 = arith.constant 0 : i32
    return %arg0, %c0_i32 : i32, i32
  }
}

</mosaic_0001>

<bundles_post_ra>
// kernel: tpu_custom_call.1
= control target key start
LH: loop header
LB: loop body
LE: loop exit
PB: predicated region body
PF: predicated region fallthrough
CT: control target
= control target key end

     0   :  { %vm30_vm0 = vcmask 130048   ;;  %s451_s0 = inlined_call_operand.vmem [shape: f32[128,16], index: 0, kind: input, shape index: {}]   ;;  %s452_s1 = inlined_call_operand.vmem [shape: f32[16,128], index: 1, kind: input, shape index: {}]   ;;  %s453_s2 = inlined_call_operand.hbm [shape: f32[128,128], index: 2, kind: output, shape index: {}]  }
   0x1   :  { %v28_v0 = vld [vmem:[%s452_s1] sm:$0xff]  ;;  %v29_v1 = vld [vmem:[%s452_s1 + $0x8] sm:$0xff]  ;;  %v14_v7 = vld [vmem:[%s451_s0 + $0x10] sm:$0xff] }
   0x2   :  { %v12_v2 = vld [vmem:[%s451_s0] sm:$0xff]  ;;  %v318_v3 = vpack.c.bf16 %v29_v1, %v28_v0  ;;  %v13_v5 = vld [vmem:[%s451_s0 + $0x8] sm:$0xff]  ;;  %v22_v8 = vld [vmem:[%s451_s0 + $0x50] sm:$0xff] }
   0x3   :  { %294 = vmatprep.mubr.msk.f32.mxu0 %vm30_vm0, %v12_v2  ;;  %v20_v4 = vld [vmem:[%s451_s0 + $0x40] sm:$0xff]  ;;  %v21_v6 = vld [vmem:[%s451_s0 + $0x48] sm:$0xff] }
   0x4   :  { %306 = vmatprep.mubr.msk.f32.mxu1 %vm30_vm0, %v20_v4  ;;  %319 = vmatprep.subr.bf16.mxu0 %v318_v3 }
   0x5   :  { %322 = vmatprep.subr.bf16.mxu1 %v318_v3  ;;  %321 = vmatpush3.bf16.msra.mxu0 %v318_v3 }
   0x6   :  { %323 = vmatpush3.bf16.msra.mxu1 %v318_v3 }
   0x7   :  { %7 = vsyncpa [#allocation3], 0  ;;  %v15_v9 = vld [vmem:[%s451_s0 + $0x18] sm:$0xff]  ;;  %v16_v11 = vld [vmem:[%s451_s0 + $0x20] sm:$0xff] }
   0x8   :  { %295 = vmatmul.mubr.msk.f32.vlgmr.msra.gmra.mrb[0].mxu0 %vm30_vm0, %v13_v5  ;;  %v23_v10 = vld [vmem:[%s451_s0 + $0x58] sm:$0xff]  ;;  %v24_v12 = vld [vmem:[%s451_s0 + $0x60] sm:$0xff]  ;;  %v17_v13 = vld [vmem:[%s451_s0 + $0x28] sm:$0xff] }
   0x9   :  { %307 = vmatmul.mubr.msk.f32.vlgmr.msra.gmra.mrb[0].mxu1 %vm30_vm0, %v21_v6  ;;  %297 = vmatprep.mubr.msk.f32.mxu0 %vm30_vm0, %v14_v7  ;;  %v25_v14 = vld [vmem:[%s451_s0 + $0x68] sm:$0xff]  ;;  %v18_v15 = vld [vmem:[%s451_s0 + $0x30] sm:$0xff]  ;;  %v19_v17 = vld [vmem:[%s451_s0 + $0x38] sm:$0xff] }
   0xa   :  { %309 = vmatprep.mubr.msk.f32.mxu1 %vm30_vm0, %v22_v8  ;;  %v26_v16 = vld [vmem:[%s451_s0 + $0x70] sm:$0xff]  ;;  %v27_v18 = vld [vmem:[%s451_s0 + $0x78] sm:$0xff]  ;;  %s351_s0 = smov [#allocation2]  }
   0xb   :  { %s245_s16 = sshll.u32 %s351_s0, 4  ;;  %s246_s16 = int_to_ptr.vmem [resolvable:$true] %s245_s16 }
   0xc   :  { %298 = vmatmul.mubr.msk.f32.gmra.mrb[2].mxu0 %vm30_vm0, %v15_v9  ;;  %s327_s17 = scalar_lea.vmem %s246_s16, 2048  ;;  %p332_p1 = scmp.lt.s32.totalorder %s246_s16, %s246_s16 }
   0xd   :  { %310 = vmatmul.mubr.msk.f32.gmra.mrb[2].mxu1 %vm30_vm0, %v23_v10  ;;  %300 = vmatprep.mubr.msk.f32.mxu0 %vm30_vm0, %v16_v11  ;;  %p328_p0 = scmp.ne.s32.totalorder %s246_s16, %s327_s17  ;;  %p333_p2 = scmp.lt.s32.totalorder %s327_s17, %s327_s17 }
   0xe   :  { %312 = vmatprep.mubr.msk.f32.mxu1 %vm30_vm0, %v24_v12 }
   0xf   :  { %p334_p3 = por %p333_p2, %p332_p1 }
  0x10   :  { %301 = vmatmul.mubr.msk.f32.gmra.mrb[4].mxu0 %vm30_vm0, %v17_v13 }
  0x11   :  { %313 = vmatmul.mubr.msk.f32.gmra.mrb[4].mxu1 %vm30_vm0, %v25_v14  ;;  %303 = vmatprep.mubr.msk.f32.mxu0 %vm30_vm0, %v18_v15  ;;  %p335_p4 = pnand %p334_p3, %p328_p0 }
  0x12   :  { %315 = vmatprep.mubr.msk.f32.mxu1 %vm30_vm0, %v26_v16 }
  0x14   :  { %304 = vmatmul.mubr.msk.f32.gmra.mrb[6].mxu0 %vm30_vm0, %v19_v17 }
  0x15   :  { %316 = vmatmul.mubr.msk.f32.gmra.mrb[6].mxu1 %vm30_vm0, %v27_v18 }
  0xdb   :  { %v296_v19 = vpop.f32.mrb[0].mxu0 }
  0xdc   :  { %v308_v20 = vpop.f32.mrb[0].mxu1  ;;  %225 = vst [vmem:[#allocation2 + $0x8] sm:$0xff] %v296_v19  ;;  %v145_v21 = vpop.f32.mrb[1].mxu0 }
  0xdd   :  { %233 = vst [vmem:[#allocation2 + $0x48] sm:$0xff] %v308_v20  ;;  %v185_v22 = vpop.f32.mrb[1].mxu1  ;;  %224 = vst [vmem:[#allocation2] sm:$0xff] %v145_v21 }
  0xde   :  { %232 = vst [vmem:[#allocation2 + $0x40] sm:$0xff] %v185_v22 }
  0xdf   :  { %v299_v23 = vpop.f32.mrb[2].mxu0 }
  0xe0   :  { %v311_v24 = vpop.f32.mrb[2].mxu1  ;;  %227 = vst [vmem:[#allocation2 + $0x18] sm:$0xff] %v299_v23  ;;  %v155_v25 = vpop.f32.mrb[3].mxu0 }
  0xe1   :  { %235 = vst [vmem:[#allocation2 + $0x58] sm:$0xff] %v311_v24  ;;  %v195_v26 = vpop.f32.mrb[3].mxu1  ;;  %226 = vst [vmem:[#allocation2 + $0x10] sm:$0xff] %v155_v25 }
  0xe2   :  { %234 = vst [vmem:[#allocation2 + $0x50] sm:$0xff] %v195_v26 }
  0xe3   :  { %v302_v27 = vpop.f32.mrb[4].mxu0 }
  0xe4   :  { %v314_v28 = vpop.f32.mrb[4].mxu1  ;;  %229 = vst [vmem:[#allocation2 + $0x28] sm:$0xff] %v302_v27  ;;  %v165_v29 = vpop.f32.mrb[5].mxu0 }
  0xe5   :  { %237 = vst [vmem:[#allocation2 + $0x68] sm:$0xff] %v314_v28  ;;  %v205_v30 = vpop.f32.mrb[5].mxu1  ;;  %228 = vst [vmem:[#allocation2 + $0x20] sm:$0xff] %v165_v29 }
  0xe6   :  { %236 = vst [vmem:[#allocation2 + $0x60] sm:$0xff] %v205_v30 }
  0xe7   :  { %v305_v31 = vpop.f32.mrb[6].mxu0 }
  0xe8   :  { %v317_v32 = vpop.f32.mrb[6].mxu1  ;;  %231 = vst [vmem:[#allocation2 + $0x38] sm:$0xff] %v305_v31  ;;  %v175_v33 = vpop.f32.mrb[7].mxu0 }
  0xe9   :  { %239 = vst [vmem:[#allocation2 + $0x78] sm:$0xff] %v317_v32  ;;  %v215_v34 = vpop.f32.mrb[7].mxu1  ;;  %230 = vst [vmem:[#allocation2 + $0x30] sm:$0xff] %v175_v33 }
  0xea   :  { %238 = vst [vmem:[#allocation2 + $0x70] sm:$0xff] %v215_v34 }
  0xeb   :  { %338 = shalt.err (!%p335_p4)
}
  0xec   :  { %s339_s19 = scalar_lea.hbm %s453_s2, 2048 }
  0xed   :  { %p340_p5 = scmp.ne.s32.totalorder %s453_s2, %s339_s19  ;;  %p343_p6 = scmp.lt.u32.totalorder %s339_s19, %s453_s2 }
  0xef   :  { %p345_p7 = pnand %p343_p6, %p340_p5 }
  0xf1   :  { %348 = shalt.err (!%p345_p7)
}
  0xf2   :  { %s352_s24 = smov 128   ;;  %s353_s25 = smov 8  }
  0xf3   :  { %251 = dma.vmem_to_hbm [thread:$0]  %s246_s16, 2048, %s453_s2, [#allocation3], %s352_s24, %s352_s24, %s353_s25  }
  0xf4   :  { %349 = dma.done.wait [#allocation3], 2048  }
  0xf5   :  { %350 = vsyncadd [#allocation3], 4294965248 }
  0xf6   :  { %255 = vsyncpa [#allocation3], 1 }

</bundles_post_ra>
